<compile_context>
chip_gen: v5e
topology: v5e:2x2
jax: 0.10.0
libtpu: 0.0.40
codegen_flags: <defaults>
</compile_context>

<pallas_src>
import numpy as np
import jax
import jax.numpy as jnp
from jax.experimental import pallas as pl
from jax.experimental.pallas import tpu as pltpu


# ----------------------------------------------------------------------------
# Host-side glue: build bicubic interpolation matrices (PyTorch semantics).
# ----------------------------------------------------------------------------
def _cubic_weight(t, a=-0.75):
    at = np.abs(t)
    at2 = at * at
    at3 = at2 * at
    w1 = (a + 2.0) * at3 - (a + 3.0) * at2 + 1.0
    w2 = a * at3 - 5.0 * a * at2 + 8.0 * a * at - 4.0 * a
    return np.where(at <= 1.0, w1, np.where(at < 2.0, w2, 0.0))


def _resize_matrix(in_size: int, out_size: int) -> np.ndarray:
    """(out_size, in_size) matrix s.t. out = W @ in reproduces 1-D bicubic
    interpolation with align_corners=False and border clamping."""
    scale = in_size / out_size
    out_idx = np.arange(out_size, dtype=np.float64)
    src = (out_idx + 0.5) * scale - 0.5
    base = np.floor(src).astype(np.int64)
    frac = src - base
    W = np.zeros((out_size, in_size), dtype=np.float32)
    for k in (-1, 0, 1, 2):
        idx = np.clip(base + k, 0, in_size - 1)
        w = _cubic_weight(frac - k)
        for o in range(out_size):
            W[o, idx[o]] += np.float32(w[o])
    return W


def _round_up(x: int, m: int) -> int:
    return -(-x // m) * m


# ----------------------------------------------------------------------------
# Pallas kernel + wrapper
# ----------------------------------------------------------------------------
def make_transform(image_size, mean, std, in_hw, channels=3):
    H_out, W_out = image_size
    H_in, W_in = in_hw
    C = channels

    Wh = _resize_matrix(H_in, H_out)            # (H_out, H_in)
    Wwt = _resize_matrix(W_in, W_out).T.copy()  # (W_in,  W_out)

    mean = np.asarray(mean, np.float32)
    std = np.asarray(std, np.float32)
    # Fold ConvertImageDtype (/255) and Normalize into a per-channel affine:
    #   y = round_clamp(resize(x)) * (1/(255*std)) + (-mean/std)
    scale = (1.0 / (255.0 * std)).astype(np.float32)   # (C,)
    bias = (-mean / std).astype(np.float32)            # (C,)

    # bf16 weights -> native MXU rate; accumulation stays f32.
    wh_j = jnp.asarray(Wh, dtype=jnp.bfloat16)     # (H_out, H_in)
    wwt_j = jnp.asarray(Wwt, dtype=jnp.bfloat16)   # (W_in,  W_out)
    scale_j = jnp.asarray(scale)                   # (C,) f32, lives in SMEM
    bias_j = jnp.asarray(bias)                     # (C,) f32, lives in SMEM

    def kernel(x_ref, wh_ref, wwt_ref, scale_ref, bias_ref, o_ref):
        c = pl.program_id(1)
        # uint8 -> bf16 directly in VMEM (0..255 exact in bf16; no i32/f32 slabs).
        x_bf = x_ref[0, 0].astype(jnp.bfloat16)                   # (H_in, W_in)
        # Width interpolation.
        t = jnp.dot(x_bf, wwt_ref[...],
                    preferred_element_type=jnp.float32)           # (H_in, W_out) f32
        # Height interpolation (dense per-channel weight, no block-diag waste).
        y = jnp.dot(wh_ref[...], t.astype(jnp.bfloat16),
                    preferred_element_type=jnp.float32)           # (H_out, W_out) f32
        # torchvision rounds + clamps integer images back to the uint8 range.
        y = jnp.clip(jnp.round(y), 0.0, 255.0)
        # Per-channel affine with SMEM scalars.
        o_ref[0, 0] = y * scale_ref[c] + bias_ref[c]

    # VMEM budget from the (double-buffered) block footprint, capped at 32 MiB
    # so there is headroom on v7x (64 MiB physical per TensorCore).
    blk_bytes = (
        2 * _round_up(H_in, 32) * _round_up(W_in, 128) * 1        # x block, u8
        + 2 * _round_up(H_out, 8) * _round_up(W_out, 128) * 4     # out block, f32
        + 2 * _round_up(H_out, 16) * _round_up(H_in, 128) * 2     # Wh, bf16
        + 2 * _round_up(W_in, 16) * _round_up(W_out, 128) * 2     # Wwt, bf16
        + _round_up(H_in, 8) * _round_up(W_out, 128) * 4          # t temp, f32
        + _round_up(H_out, 8) * _round_up(W_out, 128) * 4         # y temp, f32
    )
    vmem_limit = int(min(max(4 * blk_bytes, 8 << 20), 32 << 20))

    @jax.jit
    def apply(x_u8):
        B = x_u8.shape[0]
        flops = 2 * B * C * (H_in * W_in * W_out + H_out * H_in * W_out)
        bytes_accessed = (B * C * (H_in * W_in                    # uint8 input
                                   + H_out * W_out * 4)           # f32 output
                          + int(wh_j.size) * 2 + int(wwt_j.size) * 2
                          + (int(scale_j.size) + int(bias_j.size)) * 4)
        return pl.pallas_call(
            kernel,
            out_shape=jax.ShapeDtypeStruct((B, C, H_out, W_out), jnp.float32),
            grid_spec=pltpu.PrefetchScalarGridSpec(
                num_scalar_prefetch=0,
                grid=(B, C),
                in_specs=[
                    pl.BlockSpec((1, 1, H_in, W_in), lambda b, c: (b, c, 0, 0)),
                    pl.BlockSpec((H_out, H_in), lambda b, c: (0, 0)),
                    pl.BlockSpec((W_in, W_out), lambda b, c: (0, 0)),
                    pl.BlockSpec(memory_space=pltpu.MemorySpace.SMEM),
                    pl.BlockSpec(memory_space=pltpu.MemorySpace.SMEM),
                ],
                out_specs=pl.BlockSpec((1, 1, H_out, W_out),
                                       lambda b, c: (b, c, 0, 0)),
            ),
            compiler_params=pltpu.CompilerParams(
                dimension_semantics=("parallel", "parallel"),
                vmem_limit_bytes=vmem_limit),
            cost_estimate=pl.CostEstimate(
                flops=flops, transcendentals=0, bytes_accessed=bytes_accessed),
        )(x_u8, wh_j, wwt_j, scale_j, bias_j)

    def reference(x_u8):
        # Pure-JAX reference mirroring the kernel's bf16-operand / f32-accum math.
        xb = x_u8.astype(jnp.float32).astype(jnp.bfloat16)        # (B,C,H_in,W_in)
        t = jnp.einsum('bchw,wo->bcho', xb, wwt_j,
                       preferred_element_type=jnp.float32)
        y = jnp.einsum('oh,bchw->bcow', wh_j, t.astype(jnp.bfloat16),
                       preferred_element_type=jnp.float32)
        y = jnp.clip(jnp.round(y), 0.0, 255.0)
        y = y * scale_j[None, :, None, None] + bias_j[None, :, None, None]
        return y.astype(jnp.float32)

    return apply, reference


# ----------------------------------------------------------------------------
if __name__ == "__main__":
    # Small, deterministic example consistent with the module:
    # uint8 NCHW image batch, resized 16x16 -> 8x8, ImageNet-style mean/std.
    B, C, H_in, W_in = 2, 3, 16, 16
    image_size = (8, 8)
    mean = (0.485, 0.456, 0.406)
    std = (0.229, 0.224, 0.225)

    key = jax.random.PRNGKey(0)
    x = jax.random.randint(key, (B, C, H_in, W_in), 0, 256,
                           dtype=jnp.int32).astype(jnp.uint8)

    apply_fn, ref_fn = make_transform(image_size, mean, std, (H_in, W_in), C)

    out = jax.block_until_ready(apply_fn(x))
    ref = jax.block_until_ready(ref_fn(x))

    assert out.shape == (B, C, image_size[0], image_size[1])
    assert out.dtype == jnp.float32
    # atol = one uint8 quantization step in normalized space (~0.0175): covers
    # rare round() flips from bf16 accumulation-order differences.
    np.testing.assert_allclose(np.asarray(out), np.asarray(ref),
                               rtol=0.0, atol=0.02)

    print("KERNEL_OK")
</pallas_src>

<mosaic_0001>
module attributes {stable_mosaic.version = 11 : i64} {
  func.func @kernel(%arg0: i32, %arg1: i32, %arg2: memref<1x1x16x16xi8, #tpu.memory_space<vmem>>, %arg3: memref<8x16xbf16, #tpu.memory_space<vmem>>, %arg4: memref<16x8xbf16, #tpu.memory_space<vmem>>, %arg5: memref<3xf32, #tpu.memory_space<smem>>, %arg6: memref<3xf32, #tpu.memory_space<smem>>, %arg7: memref<1x1x8x8xf32, #tpu.memory_space<vmem>>) attributes {dimension_semantics = [#tpu.dimension_semantics<parallel>, #tpu.dimension_semantics<parallel>], iteration_bounds = array<i64: 2, 3>, scalar_prefetch = 0 : i64, scratch_operands = 0 : i64, tpu.core_type = #tpu.core_type<tc>, window_params = [{transform_indices = @transform_0, window_bounds = array<i64: 1, 1, 16, 16>}, {pipeline_mode = #tpu.pipeline_mode<synchronous>, transform_indices = @transform_1, window_bounds = array<i64: 8, 16>}, {pipeline_mode = #tpu.pipeline_mode<synchronous>, transform_indices = @transform_2, window_bounds = array<i64: 16, 8>}, {transform_indices = @transform_3, window_bounds = array<i64: 3>}, {transform_indices = @transform_4, window_bounds = array<i64: 3>}, {transform_indices = @transform_5, window_bounds = array<i64: 1, 1, 8, 8>}]} {
    %c0 = arith.constant 0 : index
    %c0_0 = arith.constant 0 : index
    %c0_1 = arith.constant 0 : index
    %c0_2 = arith.constant 0 : index
    %0 = vector.load %arg2[%c0, %c0_0, %c0_1, %c0_2] : memref<1x1x16x16xi8, #tpu.memory_space<vmem>>, vector<1x1x16x16xi8>
    %1 = vector.shape_cast %0 : vector<1x1x16x16xi8> to vector<16x16xi8>
    %2 = arith.uitofp %1 : vector<16x16xi8> to vector<16x16xbf16>
    %c0_3 = arith.constant 0 : index
    %c0_4 = arith.constant 0 : index
    %3 = vector.load %arg4[%c0_3, %c0_4] : memref<16x8xbf16, #tpu.memory_space<vmem>>, vector<16x8xbf16>
    %cst = arith.constant dense<0.000000e+00> : vector<16x8xf32>
    %4 = tpu.matmul %2, %3, %cst {dimension_numbers = #tpu.dot_dimension_numbers<[1], [0], [0], [1], [0, 0, 1, 1], [], []>} : vector<16x16xbf16>, vector<16x8xbf16>, vector<16x8xf32> -> vector<16x8xf32>
    %c0_5 = arith.constant 0 : index
    %c0_6 = arith.constant 0 : index
    %5 = vector.load %arg3[%c0_5, %c0_6] : memref<8x16xbf16, #tpu.memory_space<vmem>>, vector<8x16xbf16>
    %6 = arith.truncf %4 : vector<16x8xf32> to vector<16x8xbf16>
    %cst_7 = arith.constant dense<0.000000e+00> : vector<8x8xf32>
    %7 = tpu.matmul %5, %6, %cst_7 {dimension_numbers = #tpu.dot_dimension_numbers<[1], [0], [0], [1], [0, 0, 1, 1], [], []>} : vector<8x16xbf16>, vector<16x8xbf16>, vector<8x8xf32> -> vector<8x8xf32>
    %8 = math.roundeven %7 : vector<8x8xf32>
    %cst_8 = arith.constant 0.000000e+00 : f32
    %cst_9 = arith.constant 2.550000e+02 : f32
    %9 = vector.broadcast %cst_8 : f32 to vector<8x8xf32>
    %10 = arith.maximumf %9, %8 : vector<8x8xf32>
    %11 = vector.broadcast %cst_9 : f32 to vector<8x8xf32>
    %12 = arith.minimumf %11, %10 : vector<8x8xf32>
    %13 = arith.index_cast %arg1 : i32 to index
    %14 = memref.load %arg5[%13] : memref<3xf32, #tpu.memory_space<smem>>
    %15 = vector.broadcast %14 : f32 to vector<8x8xf32>
    %16 = arith.mulf %12, %15 : vector<8x8xf32>
    %17 = arith.index_cast %arg1 : i32 to index
    %18 = memref.load %arg6[%17] : memref<3xf32, #tpu.memory_space<smem>>
    %19 = vector.broadcast %18 : f32 to vector<8x8xf32>
    %20 = arith.addf %16, %19 : vector<8x8xf32>
    %c0_10 = arith.constant 0 : index
    %c0_11 = arith.constant 0 : index
    %c0_12 = arith.constant 0 : index
    %c0_13 = arith.constant 0 : index
    %21 = vector.load %arg7[%c0_10, %c0_11, %c0_12, %c0_13] : memref<1x1x8x8xf32, #tpu.memory_space<vmem>>, vector<1x1x8x8xf32>
    %22 = vector.shape_cast %21 : vector<1x1x8x8xf32> to vector<8x8xf32>
    %23 = vector.shape_cast %20 : vector<8x8xf32> to vector<1x1x8x8xf32>
    tpu.vector_store %arg7[%c0_10, %c0_11, %c0_12, %c0_13], %23 {strides = array<i32>} : memref<1x1x8x8xf32, #tpu.memory_space<vmem>>, vector<1x1x8x8xf32>,
    return
  }
  func.func @transform_0(%arg0: i32, %arg1: i32) -> (i32, i32, i32, i32) {
    %c0_i32 = arith.constant 0 : i32
    %c0_i32_0 = arith.constant 0 : i32
    %c0_i32_1 = arith.constant 0 : i32
    return %arg0, %arg1, %c0_i32, %c0_i32_0 : i32, i32, i32, i32
  }
  func.func @transform_1(%arg0: i32, %arg1: i32) -> (i32, i32) {
    %c0_i32 = arith.constant 0 : i32
    %c0_i32_0 = arith.constant 0 : i32
    %c0_i32_1 = arith.constant 0 : i32
    return %c0_i32, %c0_i32_0 : i32, i32
  }
  func.func @transform_2(%arg0: i32, %arg1: i32) -> (i32, i32) {
    %c0_i32 = arith.constant 0 : i32
    %c0_i32_0 = arith.constant 0 : i32
    %c0_i32_1 = arith.constant 0 : i32
    return %c0_i32, %c0_i32_0 : i32, i32
  }
  func.func @transform_3(%arg0: i32, %arg1: i32) -> i32 {
    %c0_i32 = arith.constant 0 : i32
    %c0_i32_0 = arith.constant 0 : i32
    return %c0_i32 : i32
  }
  func.func @transform_4(%arg0: i32, %arg1: i32) -> i32 {
    %c0_i32 = arith.constant 0 : i32
    %c0_i32_0 = arith.constant 0 : i32
    return %c0_i32 : i32
  }
  func.func @transform_5(%arg0: i32, %arg1: i32) -> (i32, i32, i32, i32) {
    %c0_i32 = arith.constant 0 : i32
    %c0_i32_0 = arith.constant 0 : i32
    %c0_i32_1 = arith.constant 0 : i32
    return %arg0, %arg1, %c0_i32, %c0_i32_0 : i32, i32, i32, i32
  }
}

</mosaic_0001>

<bundles_post_ra>
// kernel: apply.1
= control target key start
LH: loop header
LB: loop body
LE: loop exit
PB: predicated region body
PF: predicated region fallthrough
CT: control target
= control target key end

     0   :  { %s1170_s0 = inlined_call_operand.hbm [shape: u8[2,3,16,16], index: 0, kind: input, shape index: {}]   ;;  %s1171_s1 = inlined_call_operand.hbm [shape: bf16[8,16], index: 1, kind: input, shape index: {}]   ;;  %s1172_s2 = inlined_call_operand.hbm [shape: bf16[16,8], index: 2, kind: input, shape index: {}]   ;;  %s1173_s3 = inlined_call_operand.vmem [shape: f32[3], index: 3, kind: input, shape index: {}]   ;;  %s1174_s4 = inlined_call_operand.vmem [shape: f32[3], index: 4, kind: input, shape index: {}]   ;;  %s1175_s5 = inlined_call_operand.hbm [shape: f32[2,3,8,8], index: 5, kind: output, shape index: {}]  }
   0x1   :  { %1182 = sst [smem:[#allocation23_spill]] %s1171_s1 }
   0x2   :  { %1183 = sst [smem:[#allocation24_spill]] %s1172_s2 }
   0x3   :  { %1184 = sst [smem:[#allocation25_spill]] %s1173_s3 }
   0x4   :  { %1185 = sst [smem:[#allocation26_spill]] %s1174_s4 }
   0x5   :  { %10 = vsyncpa [#allocation3], 0 }
   0x6   :  { %12 = vsyncpa [#allocation3 + $0x1], 0 }
   0x7   :  { %13 = vsyncpa [#allocation7], 0 }
   0x8   :  { %14 = vsyncpa [#allocation5], 0 }
   0x9   :  { %15 = vsyncpa [#allocation11], 0 }
   0xa   :  { %16 = vsyncpa [#allocation4], 0 }
   0xb   :  { %18 = vsyncpa [#allocation4 + $0x1], 0  ;;  %s967_s18 = smov 0   ;;  %s969_s19 = smov 0  }
   0xc   :  { %s971_s20 = smov 0   ;;  %s973_s21 = smov 0  }
   0xd   :  { %s975_s22 = smov 0   ;;  %s977_s23 = smov 0  }
   0xe   :  { %s979_s24 = smov 0   ;;  %s981_s25 = smov 0  }
   0xf LB: > { %1186 = sst [smem:[#allocation18_spill]] %s899_s18  ;;  %s531_s26 = sadd.s32 4294967295, %s927_s25   ;;  %s927_s25 = sphi %s981_s25, %s24_s25   ;;  %s923_s24 = sphi %s979_s24, %s1214_s24   ;;  %s919_s23 = sphi %s977_s23, %s1213_s23   ;;  %s915_s22 = sphi %s975_s22, %s1212_s22   ;;  %s911_s21 = sphi %s973_s21, %s1211_s21   ;;  %s907_s20 = sphi %s971_s20, %s1210_s20   ;;  %s903_s19 = sphi %s969_s19, %s1209_s19   ;;  %s899_s18 = sphi %s967_s18, %s1208_s18  }
  0x10   : > { %1187 = sst [smem:[#allocation19_spill]] %s927_s25  ;;  %s532_s27 = sadd.s32 4294967294, %s927_s25  }
  0x11   : > { %p58_p0 = scmp.ne.s32.totalorder %s903_s19, %s899_s18  ;;  %p1011_p1 = scmp.eq.s32.totalorder %s531_s26, 0 }
  0x12   : > { %p1015_p2 = scmp.eq.s32.totalorder %s531_s26, 5  ;;  %p174_p3 = scmp.eq.s32.totalorder %s532_s27, 5 }
  0x13   : > { %p1021_p4 = por %p1011_p1, %p58_p0  ;;  %p533_p5 = scmp.ge.s32.totalorder %s927_s25, 1 }
  0x14   : > { %p1026_p6 = por %p174_p3, %p58_p0  ;;  %p181_p7 = scmp.lt.s32.totalorder %s927_s25, 7 }
  0x15   : > { %s1193_s1 = sld [smem:[#allocation23_spill]]  ;;  %s929_s11 = smov [#allocation6]  }
  0x16   : > { %s1191_s6 = scalar_select %p1026_p6, 1, 0 }
  0x17   : > { %p1034_p8 = pnand %p533_p5, %p181_p7  ;;  %s195_s12 = sshll.u32 %s929_s11, 4  ;;  %s196_s12 = int_to_ptr.vmem [resolvable:$true] %s195_s12 }
  0x18   : > { %1192 = sst [smem:[#allocation20_spill]] %s1191_s6  ;;  %s930_s17 = smov [#allocation8]  }
  0x19   : > { %p594_p9 = pneg %p1034_p8  ;;  %s1195_s2 = sld [smem:[#allocation24_spill]] }
  0x1a   : > { %s206_s26 = sshll.u32 %s930_s17, 4  ;;  %s931_s27 = smov 64   ;;  %s207_s26 = int_to_ptr.vmem [resolvable:$true] %s206_s26 }
  0x1b   : > { %s193_s9 = sshll.u32 %s1193_s1, 4  ;;  %p1045_p10 = pnand %p594_p9, %p1011_p1  ;;  %s194_s9 = int_to_ptr.hbm [resolvable:$true] %s193_s9 }
  0x1c   : > { %s932_s7 = smov 4   ;;  %s1197_s3 = sld [smem:[#allocation25_spill]] }
  0x1d   : > { %597 = dma.hbm_to_vmem [thread:$0]  (!%p1045_p10), %s194_s9, 64, %s196_s12, [#allocation7]  }
  0x1e   : > { %s1198_s4 = sld [smem:[#allocation26_spill]]  ;;  %s933_s12 = smov [#allocation9]  }
  0x1f   : > { %s204_s15 = sshll.u32 %s1195_s2, 4  ;;  %s934_s1 = smov [#allocation10]   ;;  %s205_s15 = int_to_ptr.hbm [resolvable:$true] %s204_s15 }
  0x20   : > { %600 = dma.hbm_to_vmem [thread:$0]  (!%p1045_p10), %s205_s15, 128, %s207_s26, [#allocation7], %s931_s27, %s931_s27, %s932_s7  }
  0x21   : > { %s33_s15 = sadd.s32 1, %s919_s23  ;;  %s36_s26 = sadd.s32 1, %s923_s24 }
  0x22   : > { %s219_s13 = sshll.u32 %s1197_s3, 4  ;;  %p34_p11 = scmp.ge.s32.totalorder %s33_s15, 3  ;;  %s220_s13 = int_to_ptr.vmem [resolvable:$true] %s219_s13 }
  0x23   : > { %603 = dma.vmem_to_smem (!%p1045_p10), %s220_s13, 16, %s933_s12, [#allocation5]  }
  0x24   : > { %s229_s9 = sshll.u32 %s1198_s4, 4  ;;  %s45_s27 = sadd.s32 1, %s907_s20  ;;  %s230_s9 = int_to_ptr.vmem [resolvable:$true] %s229_s9 }
  0x25   : > { %606 = dma.vmem_to_smem (!%p1045_p10), %s230_s9, 16, %s934_s1, [#allocation11]  }
  0x26   : > { %p52_p12 = scmp.ne.s32.totalorder %s907_s20, %s903_s19  ;;  %p53_p13 = scmp.eq.s32.totalorder %s927_s25, 0 }
  0x27   : > { %s1216_s15 = smov (%p34_p11, %s33_s15), 0  ;;  %s1218_s26 = smov (!%p34_p11, %s36_s26), %s923_s24 }
  0x28   : > { %1199 = sst [smem:[#allocation21_spill]] %s1216_s15  ;;  %s41_s7 = ssub.s32 %s919_s23, %s1216_s15 }
  0x29   : > { %p1074_p0 = por %p53_p13, %p52_p12  ;;  %p38_p3 = scmp.ge.s32.totalorder %s1218_s26, 2 }
  0x2a   : > { %p1080_p5 = por %p1015_p2, %p52_p12  ;;  %p619_p7 = scmp.lt.s32.totalorder %s927_s25, 6 }
  0x2b   : > { %s240_s16 = sand.u32 1, %s907_s20   ;;  %s1220_s26 = smov (%p38_p3, %s1218_s26), 0 }
  0x2c   : > { %1202 = sst [smem:[#allocation22_spill]] %s1220_s26  ;;  %s539_s11 = sshll.u32 %s240_s16, 2 }
  0x2d   : > { %s40_s13 = ssub.s32 %s923_s24, %s1220_s26  ;;  %s540_s17 = sshll.u32 %s919_s23, 1 }
  0x2e   : > { %s42_s14 = sor.u32 %s41_s7, %s40_s13  ;;  %s564_s9 = smul.u32 6, %s923_s24 }
  0x2f   : > { %p43_p9 = scmp.eq.s32.totalorder %s42_s14, 0  ;;  %s244_s12 = scalar_lea.vmem [#allocation2], %s539_s11 }
  0x30   : > { %s254_s2 = sshll.u32 %s244_s12, 4  ;;  %p608_p10 = pnand %p619_p7, %p1074_p0  ;;  %s255_s2 = int_to_ptr.vmem [resolvable:$true] %s254_s2 }
  0x31   : > { %s1095_s29 = scalar_select %p43_p9, %s907_s20, %s45_s27  }
  0x32   : > { %s249_s3 = sadd.s32 %s564_s9, %s540_s17  ;;  %s241_s26 = scalar_lea.sflag [#allocation3], %s240_s16 }
  0x33   : > { %s541_s4 = sshll.u32 %s249_s3, 1  ;;  %s935_s7 = smov 32  }
  0x34   : > { %s251_s18 = scalar_lea.hbm %s1170_s0, %s541_s4  ;;  %s936_s13 = smov 2  }
  0x35   : > { %s252_s25 = sshll.u32 %s251_s18, 4  ;;  %266 = sbr.rel (%p1034_p8) target bundleno = 361 (0x169), region = 40  ;;  %s253_s25 = int_to_ptr.hbm [resolvable:$true] %s252_s25 }
  0x36   : > { %610 = dma.hbm_to_vmem [thread:$0]  (!%p608_p10), %s253_s25, 64, %s255_s2, %s241_s26, %s935_s7, %s935_s7, %s936_s13  }
  0x37   : > { %s1103_s27 = sand.u32 (!%p1034_p8), 1, %s903_s19  }
  0x38   : > { %s543_s3 = sshll.u32 (!%p1034_p8), %s1103_s27, 2  ;;  %s269_s8 = scalar_lea.sflag (!%p1034_p8), [#allocation3], %s1103_s27 }
  0x39   : > { %s272_s11 = scalar_lea.vmem (!%p1034_p8), [#allocation2], %s543_s3 }
  0x3a   : > { %878 = dma.done.wait (%p1021_p4), %s269_s8, 64  }
  0x3b   : > { %880 = vsyncadd (%p1021_p4), %s269_s8, 4294967232 }
  0x3c   : > { %882 = dma.done.wait (%p1011_p1), [#allocation7], 192  }
  0x3d   : > { %884 = vsyncadd (%p1011_p1), [#allocation7], 4294967104 }
  0x3e   : > { %886 = dma.done.wait (%p1011_p1), [#allocation5], 16  }
  0x3f   : > { %888 = vsyncadd (%p1011_p1), [#allocation5], 4294967280 }
  0x40   : > { %890 = dma.done.wait (%p1011_p1), [#allocation11], 16  }
  0x41   : > { %892 = vsyncadd (%p1011_p1), [#allocation11], 4294967280 }
  0x42   : > { %298 = sfence }
  0x43   : > { %v559_v0 = vld [vmem:[#allocation8] sm:$0xff]  ;;  %v561_v1 = vld [vmem:[%s272_s11] sm:$0xf]   ;;  %vm339_vm0 = vcmask 130048   ;;  %v357_v12 = vld [vmem:[#allocation6] sm:$0xf] }
  0x44   : > { %v562_v2 = vunpack.c.0.s8 %v561_v1  ;;  %v563_v3 = vunpack.c.1.s8 %v561_v1  ;;  %350 = vmatpush.bf16.msra.mxu0 %v559_v0  ;;  %s573_s2 = smul.u32 3, %s915_s22  ;;  %s378_s4 = sld [smem:[#allocation9 + %s911_s21]]  ;;  %vm384_vm2 = vcmask 64512  }
  0x45   : > { %s381_s25 = sld [smem:[#allocation10 + %s911_s21]]  ;;  %s548_s28 = sshll.u32 %s1103_s27, 3 }
  0x46   : > { %v326_v4 = vand.u32 255, %v562_v2  ;;  %v327_v5 = vand.u32 255, %v563_v3  ;;  %s397_s18 = sadd.s32 %s911_s21, %s573_s2  ;;  %s320_s15 = scalar_lea.vmem [#allocation12], %s548_s28 }
  0x47   : > { %s556_s30 = sshll.u32 %s397_s18, 3  ;;  %s401_s26 = sshll.u32 %s320_s15, 4  ;;  %s402_s26 = int_to_ptr.vmem [resolvable:$true] %s401_s26 }
  0x48   : > { %v328_v6 = vcvt.s32.f32 %v326_v4  ;;  %v329_v7 = vcvt.s32.f32 %v327_v5  ;;  %s399_s22 = scalar_lea.hbm %s1175_s5, %s556_s30  ;;  %s387_s21 = scalar_lea.sflag [#allocation4], %s1103_s27 }
  0x49   : > { %s403_s16 = sshll.u32 %s399_s22, 4  ;;  %s837_s7 = scalar_lea.hbm %s1175_s5, 48  ;;  %s404_s16 = int_to_ptr.hbm [resolvable:$true] %s403_s16 }
  0x4a   : > { %v330_v8 = vpack.c.bf16 %v329_v7, %v328_v6  ;;  %v379_v23 = vstv %s378_s4  ;;  %s831_s14 = sshra.s32 %s404_s16, 4  ;;  %s832_s14 = int_to_ptr.hbm [resolvable:$true] %s831_s14 }
  0x4b   : > { %v382_v25 = vstv %s381_s25  ;;  %s833_s17 = scalar_lea.hbm %s832_s14, 8  ;;  %p838_p8 = scmp.lt.s32.totalorder %s832_s14, %s1175_s5 }
  0x4c   : > { %553 = vmatmul.msk.bf16.vlgmr.msra.gmra.mxu0 %vm339_vm0, %v330_v8  ;;  %p834_p1 = scmp.ne.s32.totalorder %s832_s14, %s833_s17  ;;  %p839_p11 = scmp.lt.s32.totalorder %s837_s7, %s833_s17 }
  0x4e   : > { %p835_p2 = pnand %p834_p1, %p1080_p5  ;;  %p840_p12 = por %p839_p11, %p838_p8 }
  0x50   : > { %p836_p4 = pneg %p835_p2 }
  0x52   : > { %p841_p13 = pnand %p840_p12, %p836_p4 }
  0xc9   : > { %v352_v9 = vpop.f32.mrf.mxu0 }
  0xd1   : > { %v354_v10 = vpop.f32.mrf.mxu0 }
  0xd2   : > { %v358_v11 = vpack.c.bf16 %v354_v10, %v352_v9 }
  0xd4   : > { %369 = vmatpush.bf16.msra.mxu1 %v358_v11 }
  0xd7   : > { %554 = vmatmul.msk.bf16.vlgmr.msra.gmra.mxu1 %vm339_vm0, %v357_v12 }
 0x154   : > { %v371_v13 = vpop.f32.mrf.mxu1 }
 0x155   : > { %v567_v14 = vcvt.f32.s32 %v371_v13  ;;  %v565_v16 = vand.u32 2147483647, %v371_v13  ;;  %v570_v18 = vand.u32 2147483648, %v371_v13 }
 0x157   : > { %v568_v15 = vcvt.s32.f32 %v567_v14  ;;  %vm566_vm1 = vcmp.lt.f32.partialorder %v565_v16, 8388608.0 }
 0x159   : > { %v569_v17 = vand.u32 2147483647, %v568_v15 }
 0x15b   : > { %v571_v19 = vor.u32 %v570_v18, %v569_v17 }
 0x15c   : > { %v373_v20 = vpop.f32.mrf.mxu1 }
 0x15d   : > { %v572_v21 = vsel %vm566_vm1, %v571_v19, %v371_v13 }
 0x15e   : > { %v376_v22 = vmax.f32 %v572_v21, 0.0 }
 0x160   : > { %v377_v24 = vmin.f32 %v376_v22, 255.0 }
 0x162   : > { %v380_v26 = vmul.f32 %v379_v23, %v377_v24 }
 0x164   : > { %v383_v27 = vadd.f32 %v382_v25, %v380_v26 }
 0x166   : > { %385 = vst.msk [vmem:[%s320_s15] sm:$0xff] %vm384_vm2, %v383_v27 }
 0x167   : > { %844 = shalt.err (!%p841_p13)
}
 0x168   : > { %592 = dma.vmem_to_hbm [thread:$0]  (%p1080_p5), %s402_s26, 128, %s404_s16, %s387_s21  }
 0x169 PF: > { %s1203_s27 = sld [smem:[#allocation19_spill]] }
 0x16a   : > { %s1204_s8 = sld [smem:[#allocation18_spill]] }
 0x16f   : > { %p624_p0 = scmp.ge.s32.totalorder %s1203_s27, 2 }
 0x170   : > { %s415_s2 = sand.u32 1, %s1204_s8  }
 0x171   : > { %p612_p3 = pnand %p624_p0, %p1026_p6  ;;  %s416_s4 = scalar_lea.sflag [#allocation4], %s415_s2 }
 0x173   : > { %p613_p7 = pneg %p612_p3 }
 0x175   : > { %894 = dma.done.wait (%p613_p7), %s416_s4, 128  }
 0x176   : > { %896 = vsyncadd (%p613_p7), %s416_s4, 4294967168  ;;  %s24_s25 = sadd.s32 1, %s1203_s27   ;;  %s1206_s1 = sld [smem:[#allocation21_spill]] }
 0x177   : > { %p21_p9 = scmp.ge.s32.totalorder %s24_s25, 8   ;;  %s1207_s28 = sld [smem:[#allocation22_spill]] }
 0x178   : > { %s1208_s18 = smov %s903_s19  ;;  %s1209_s19 = smov %s907_s20 }
 0x179   : > { %s1210_s20 = smov %s1095_s29  ;;  %s1211_s21 = smov %s919_s23 }
 0x17a   : > { %s1212_s22 = smov %s923_s24  ;;  %23 = sbr.rel (!%p21_p9) target bundleno = 15 (0xf), region = 102 }
 0x17c   : > { %s1213_s23 = smov %s1206_s1 }
 0x17d   : > { %s1214_s24 = smov %s1207_s28 }
 0x17f   :  { %422 = vsyncpa [#allocation3], 1 }
 0x180   :  { %424 = vsyncpa [#allocation3 + $0x1], 1 }
 0x181   :  { %425 = vsyncpa [#allocation7], 1 }
 0x182   :  { %426 = vsyncpa [#allocation4], 1 }
 0x183   :  { %428 = vsyncpa [#allocation4 + $0x1], 1 }
 0x184   :  { %429 = vsyncpa [#allocation5], 1 }
 0x185   :  { %431 = vsyncpa [#allocation5 + $0x1], 1 }
 0x186   :  { %432 = vsyncpa [#allocation11], 1 }

</bundles_post_ra>
